<compile_context>
chip_gen: v7x
topology: tpu7x:2x2x1
jax: 0.10.0
libtpu: 0.0.40
codegen_flags: <defaults>
</compile_context>

<pallas_src>
import jax
import jax.numpy as jnp
from jax.experimental import pallas as pl
from jax.experimental.pallas import tpu as pltpu


def _round_up(x: int, m: int) -> int:
    return ((x + m - 1) // m) * m


def _pick_tile(dim_p: int, target: int, align: int) -> int:
    """Largest multiple of `align` that is <= target and divides dim_p (dim_p % align == 0)."""
    t = min(target, dim_p)
    t -= t % align
    t = max(t, align)
    while dim_p % t != 0:
        t -= align
    return t


def _linear_kernel_f32_out(x_ref, wt_ref, b_ref, o_ref):
    # x_ref: (tm, tk), wt_ref: (tk, tn), b_ref: (1, tn), o_ref: (tm, tn) f32.
    # Output block index (i, j) is k-invariant -> it stays resident in VMEM
    # across the reduction, so we accumulate straight into it (no scratch).
    k = pl.program_id(2)

    @pl.when(k == 0)
    def _():
        o_ref[...] = jnp.zeros_like(o_ref)

    o_ref[...] += jnp.dot(x_ref[...], wt_ref[...], preferred_element_type=jnp.float32)

    @pl.when(k == pl.num_programs(2) - 1)
    def _():
        o_ref[...] += b_ref[...].astype(jnp.float32)


def _linear_kernel_acc(x_ref, wt_ref, b_ref, o_ref, acc_ref):
    # Same as above, but with an f32 VMEM accumulator for non-f32 output dtypes.
    k = pl.program_id(2)

    @pl.when(k == 0)
    def _():
        acc_ref[...] = jnp.zeros_like(acc_ref)

    acc_ref[...] += jnp.dot(x_ref[...], wt_ref[...], preferred_element_type=jnp.float32)

    @pl.when(k == pl.num_programs(2) - 1)
    def _():
        o_ref[...] = (acc_ref[...] + b_ref[...].astype(jnp.float32)).astype(o_ref.dtype)


def classifier_forward(feat, weight, bias, *, tm_target=512, tn_target=512,
                       tk_target=1024, out_dtype=None):
    """feat: (B, D), weight: (C, D), bias: (C,) -> (B, C); nn.Linear semantics."""
    B, D = feat.shape
    C, D2 = weight.shape
    assert D == D2, "feature dim mismatch"
    assert bias.shape == (C,)
    out_dtype = feat.dtype if out_dtype is None else jnp.dtype(out_dtype)

    # Pad only to the (8, 128) layout alignment, never to tile multiples.
    Bp = _round_up(B, 8)
    Cp = _round_up(C, 128)
    Dp = _round_up(D, 128)

    # Tiles must divide the padded dims. Whole batch in one M block when it
    # fits (weight streams from HBM exactly once); tn target 512 (multiple of
    # 256 for the v6e/v7x 256x256 MXU); tk target 1024.
    tm = _pick_tile(Bp, tm_target, 8)
    tn = _pick_tile(Cp, tn_target, 128)
    tk = _pick_tile(Dp, tk_target, 128)

    # v7x has 2 TensorCores sharing the 'parallel' grid axes: avoid a 1x1
    # parallel grid when C is big enough to split without starving the MXU.
    if Bp // tm == 1 and Cp // tn == 1 and Cp >= 512 and Cp % 512 == 0:
        tn = Cp // 2

    # Weight fed transposed: (D, C) -> kernel tile (tk, tn), straight MXU feed.
    wt = jnp.pad(weight.T, ((0, Dp - D), (0, Cp - C)))
    xf = feat if (Bp == B and Dp == D) else jnp.pad(feat, ((0, Bp - B), (0, Dp - D)))
    bp = jnp.pad(bias, (0, Cp - C)).reshape(1, Cp)

    grid = (Bp // tm, Cp // tn, Dp // tk)

    f32_out = out_dtype == jnp.float32
    kernel = _linear_kernel_f32_out if f32_out else _linear_kernel_acc
    scratch = [] if f32_out else [pltpu.VMEM((tm, tn), jnp.float32)]

    out_p = pl.pallas_call(
        kernel,
        out_shape=jax.ShapeDtypeStruct((Bp, Cp), out_dtype),
        grid_spec=pltpu.PrefetchScalarGridSpec(
            num_scalar_prefetch=0,
            grid=grid,
            in_specs=[
                pl.BlockSpec((tm, tk), lambda i, j, k: (i, k)),   # feat tile
                pl.BlockSpec((tk, tn), lambda i, j, k: (k, j)),   # W^T tile (MXU-ready)
                pl.BlockSpec((1, tn), lambda i, j, k: (0, j)),    # bias tile
            ],
            out_specs=pl.BlockSpec((tm, tn), lambda i, j, k: (i, j)),
            scratch_shapes=scratch,
        ),
        compiler_params=pltpu.CompilerParams(
            dimension_semantics=("parallel", "parallel", "arbitrary"),
            # Explicit cap: comfortably holds double-buffered 512x1024 f32 input
            # tiles + output, and stays under v7x's 64 MiB physical VMEM.
            vmem_limit_bytes=48 * 1024 * 1024,
        ),
    )(xf, wt, bp)

    return out_p[:B, :C]


if __name__ == "__main__":
    # Shapes consistent with the module: Linear(input_dim=2048 -> num_classes=4),
    # small batch. Grid is (1, 1, 2): exercises the K accumulation + bias epilogue.
    B, D, C = 8, 2048, 4

    key = jax.random.PRNGKey(0)
    k_feat, k_w, k_b = jax.random.split(key, 3)

    feat = jax.random.normal(k_feat, (B, D), dtype=jnp.float32)
    bound = 1.0 / (D ** 0.5)  # torch default kaiming-uniform-ish bound
    weight = jax.random.uniform(k_w, (C, D), minval=-bound, maxval=bound,
                                dtype=jnp.float32)
    bias = jax.random.uniform(k_b, (C,), minval=-bound, maxval=bound,
                              dtype=jnp.float32)

    out = classifier_forward(feat, weight, bias)
    out = jax.block_until_ready(out)

    # Cross-check against plain-JAX reference.
    ref = feat @ weight.T + bias
    assert out.shape == (B, C)
    assert jnp.allclose(out, ref, atol=1e-4, rtol=1e-4)

    print("KERNEL_OK")
</pallas_src>

<mosaic_0001>
module attributes {stable_mosaic.version = 11 : i64} {
  func.func @_linear_kernel_f32_out(%arg0: i32, %arg1: i32, %arg2: i32, %arg3: memref<8x1024xf32, #tpu.memory_space<vmem>>, %arg4: memref<1024x128xf32, #tpu.memory_space<vmem>>, %arg5: memref<1x128xf32, #tpu.memory_space<vmem>>, %arg6: memref<8x128xf32, #tpu.memory_space<vmem>>) attributes {dimension_semantics = [#tpu.dimension_semantics<parallel>, #tpu.dimension_semantics<parallel>, #tpu.dimension_semantics<arbitrary>], iteration_bounds = array<i64: 1, 1, 2>, scalar_prefetch = 0 : i64, scratch_operands = 0 : i64, tpu.core_type = #tpu.core_type<tc>, window_params = [{transform_indices = @transform_0, window_bounds = array<i64: 8, 1024>}, {transform_indices = @transform_1, window_bounds = array<i64: 1024, 128>}, {transform_indices = @transform_2, window_bounds = array<i64: 1, 128>}, {transform_indices = @transform_3, window_bounds = array<i64: 8, 128>}]} {
    %c0_i32 = arith.constant 0 : i32
    %0 = arith.cmpi eq, %arg2, %c0_i32 : i32
    %1 = arith.extui %0 : i1 to i32
    %c0_i32_0 = arith.constant 0 : i32
    %2 = arith.cmpi ne, %1, %c0_i32_0 : i32
    scf.if %2 {
      %cst_9 = arith.constant 0.000000e+00 : f32
      %12 = vector.broadcast %cst_9 : f32 to vector<8x128xf32>
      %c0_10 = arith.constant 0 : index
      %c0_11 = arith.constant 0 : index
      %13 = vector.load %arg6[%c0_10, %c0_11] : memref<8x128xf32, #tpu.memory_space<vmem>>, vector<8x128xf32>
      tpu.vector_store %arg6[%c0_10, %c0_11], %12 {strides = array<i32>} : memref<8x128xf32, #tpu.memory_space<vmem>>, vector<8x128xf32>,
    } else {
    }
    %c0 = arith.constant 0 : index
    %c0_1 = arith.constant 0 : index
    %3 = vector.load %arg6[%c0, %c0_1] : memref<8x128xf32, #tpu.memory_space<vmem>>, vector<8x128xf32>
    %c0_2 = arith.constant 0 : index
    %c0_3 = arith.constant 0 : index
    %4 = vector.load %arg3[%c0_2, %c0_3] : memref<8x1024xf32, #tpu.memory_space<vmem>>, vector<8x1024xf32>
    %c0_4 = arith.constant 0 : index
    %c0_5 = arith.constant 0 : index
    %5 = vector.load %arg4[%c0_4, %c0_5] : memref<1024x128xf32, #tpu.memory_space<vmem>>, vector<1024x128xf32>
    %cst = arith.constant dense<0.000000e+00> : vector<8x128xf32>
    %6 = tpu.matmul %4, %5, %cst {dimension_numbers = #tpu.dot_dimension_numbers<[1], [0], [0], [1], [0, 0, 1, 1], [], []>} : vector<8x1024xf32>, vector<1024x128xf32>, vector<8x128xf32> -> vector<8x128xf32>
    %7 = arith.addf %3, %6 : vector<8x128xf32>
    %c0_6 = arith.constant 0 : index
    %c0_7 = arith.constant 0 : index
    %8 = vector.load %arg6[%c0_6, %c0_7] : memref<8x128xf32, #tpu.memory_space<vmem>>, vector<8x128xf32>
    tpu.vector_store %arg6[%c0_6, %c0_7], %7 {strides = array<i32>} : memref<8x128xf32, #tpu.memory_space<vmem>>, vector<8x128xf32>,
    %c1_i32 = arith.constant 1 : i32
    %9 = arith.cmpi eq, %arg2, %c1_i32 : i32
    %10 = arith.extui %9 : i1 to i32
    %c0_i32_8 = arith.constant 0 : i32
    %11 = arith.cmpi ne, %10, %c0_i32_8 : i32
    scf.if %11 {
      %c0_9 = arith.constant 0 : index
      %c0_10 = arith.constant 0 : index
      %12 = vector.load %arg6[%c0_9, %c0_10] : memref<8x128xf32, #tpu.memory_space<vmem>>, vector<8x128xf32>
      %c0_11 = arith.constant 0 : index
      %c0_12 = arith.constant 0 : index
      %13 = vector.load %arg5[%c0_11, %c0_12] : memref<1x128xf32, #tpu.memory_space<vmem>>, vector<1x128xf32>
      %14 = vector.broadcast %13 : vector<1x128xf32> to vector<8x128xf32>
      %15 = arith.addf %12, %14 : vector<8x128xf32>
      %c0_13 = arith.constant 0 : index
      %c0_14 = arith.constant 0 : index
      %16 = vector.load %arg6[%c0_13, %c0_14] : memref<8x128xf32, #tpu.memory_space<vmem>>, vector<8x128xf32>
      tpu.vector_store %arg6[%c0_13, %c0_14], %15 {strides = array<i32>} : memref<8x128xf32, #tpu.memory_space<vmem>>, vector<8x128xf32>,
    } else {
    }
    return
  }
  func.func @transform_0(%arg0: i32, %arg1: i32, %arg2: i32) -> (i32, i32) {
    %c0_i32 = arith.constant 0 : i32
    return %arg0, %arg2 : i32, i32
  }
  func.func @transform_1(%arg0: i32, %arg1: i32, %arg2: i32) -> (i32, i32) {
    %c0_i32 = arith.constant 0 : i32
    return %arg2, %arg1 : i32, i32
  }
  func.func @transform_2(%arg0: i32, %arg1: i32, %arg2: i32) -> (i32, i32) {
    %c0_i32 = arith.constant 0 : i32
    %c0_i32_0 = arith.constant 0 : i32
    return %c0_i32, %arg1 : i32, i32
  }
  func.func @transform_3(%arg0: i32, %arg1: i32, %arg2: i32) -> (i32, i32) {
    %c0_i32 = arith.constant 0 : i32
    return %arg0, %arg1 : i32, i32
  }
}

</mosaic_0001>

<bundles_post_ra>
// kernel: tpu_custom_call.1
= control target key start
LH: loop header
LB: loop body
LE: loop exit
PB: predicated region body
PF: predicated region fallthrough
CT: control target
= control target key end

     0   :  { %8 = vsyncpa [#allocation3], 0  ;;  %s1693_s0 = inlined_call_operand.hbm [shape: f32[8,2048], index: 0, kind: input, shape index: {}]   ;;  %s1694_s1 = inlined_call_operand.hbm [shape: f32[2048,128], index: 1, kind: input, shape index: {}]   ;;  %s1695_s2 = inlined_call_operand.vmem [shape: f32[1,128], index: 2, kind: input, shape index: {}]   ;;  %s1696_s3 = inlined_call_operand.hbm [shape: f32[8,128], index: 3, kind: output, shape index: {}]  }
   0x1   :  { %10 = vsyncpa [#allocation3 + $0x1], 0 }
   0x2   :  { %11 = vsyncpa [#allocation6], 0 }
   0x3   :  { %13 = vsyncpa [#allocation6 + $0x1], 0 }
   0x4   :  { %14 = vsyncpa [#allocation4], 0  ;;  %s1349_s12 = smov 0   ;;  %s1351_s13 = smov 0  }
   0x5   :  { %s1353_s14 = smov 0   ;;  %s1355_s15 = smov 0  }
   0x6   :  { %s1357_s16 = smov 0   ;;  %s1359_s17 = smov 0  }
   0x7 LB: > { %s817_s18 = sadd.s32 4294967295, %s1321_s17   ;;  %s32_s19 = sadd.s32 1, %s1317_s16  ;;  %s1321_s17 = sphi %s1359_s17, %s20_s17   ;;  %s1317_s16 = sphi %s1357_s16, %s1710_s16   ;;  %s1313_s15 = sphi %s1355_s15, %s1709_s15   ;;  %s1309_s14 = sphi %s1353_s14, %s1708_s14   ;;  %s1305_s13 = sphi %s1351_s13, %s1707_s13   ;;  %s1301_s12 = sphi %s1349_s12, %s1706_s12  }
   0x8   : > { %p33_p0 = scmp.ge.s32.totalorder %s32_s19, 2  ;;  %s48_s20 = sadd.s32 1, %s1309_s14 }
   0x9   : > { %p55_p1 = scmp.ne.s32.totalorder %s1309_s14, %s1305_s13  ;;  %p56_p2 = scmp.eq.s32.totalorder %s1321_s17, 0 }
   0xa   : > { %s1712_s19 = smov (%p33_p0, %s32_s19), 0  ;;  %p61_p4 = scmp.ne.s32.totalorder %s1305_s13, %s1301_s12 }
   0xb   : > { %p1385_p3 = por %p56_p2, %p55_p1  ;;  %s44_s22 = ssub.s32 %s1317_s16, %s1712_s19 }
   0xc   : > { %p62_p5 = scmp.eq.s32.totalorder %s817_s18, 0  ;;  %p46_p6 = scmp.eq.s32.totalorder %s44_s22, 0 }
   0xd   : > { %p1122_p8 = scmp.lt.s32.totalorder %s1321_s17, 2  ;;  %s1403_s25 = sand.u32 1, %s1309_s14  }
   0xe   : > { %p1394_p7 = por %p62_p5, %p61_p4  ;;  %s837_s26 = sshll.u32 %s1317_s16, 10 }
   0xf   : > { %s1400_s24 = scalar_select %p46_p6, %s1309_s14, %s48_s20  }
  0x10   : > { %s1699_s23 = scalar_select %p1394_p7, 1, 0 }
  0x11   : > { %s821_s27 = sshll.u32 %s1403_s25, 6  ;;  %s1410_s30 = scalar_lea.hbm %s1693_s0, %s837_s26 }
  0x12   : > { %s177_s4 = scalar_lea.vmem [#allocation2], %s821_s27  ;;  %p1414_p9 = pnand %p1122_p8, %p1385_p3 }
  0x13   : > { %s187_s5 = sshll.u32 %s177_s4, 4  ;;  %s174_s7 = scalar_lea.sflag [#allocation3], %s1403_s25  ;;  %s1418_s5 = int_to_ptr.vmem [resolvable:$true] %s187_s5 }
  0x14   : > { %s1177_s8 = scalar_lea.hbm %s1410_s30, 1024  ;;  %p1179_p13 = pneg %p1414_p9 }
  0x15   : > { %p1178_p12 = scmp.ne.s32.totalorder %s1410_s30, %s1177_s8  ;;  %s1182_s11 = scalar_lea.hbm %s1693_s0, 2048 }
  0x16   : > { %p1183_p2 = scmp.lt.u32.totalorder %s1410_s30, %s1693_s0  ;;  %p1184_p3 = scmp.lt.u32.totalorder %s1182_s11, %s1177_s8 }
  0x17   : > { %p1180_p0 = pnand %p1179_p13, %p1178_p12  ;;  %p1186_p5 = scmp.lt.u32.totalorder %s1177_s8, %s1410_s30 }
  0x18   : > { %p1185_p4 = por %p1184_p3, %p1183_p2 }
  0x19   : > { %p1181_p1 = pneg %p1180_p0 }
  0x1a   : > { %p1187_p6 = por %p1186_p5, %p1185_p4 }
  0x1c   : > { %p1188_p8 = pnand %p1187_p6, %p1181_p1 }
  0x1e   : > { %1191 = shalt.err (!%p1188_p8)
}
  0x1f   : > { %s1192_s21 = scalar_lea.vmem %s1418_s5, 1024  ;;  %s1323_s22 = smov [#allocation2]  }
  0x20   : > { %p1193_p12 = scmp.ne.s32.totalorder %s1418_s5, %s1192_s21  ;;  %s1197_s26 = sshll.u32 %s1323_s22, 4  ;;  %s1198_s26 = int_to_ptr.vmem [resolvable:$false] %s1197_s26 }
  0x21   : > { %s1199_s27 = scalar_lea.vmem %s1198_s26, 2048  ;;  %p1200_p11 = scmp.lt.s32.totalorder %s1418_s5, %s1198_s26 }
  0x22   : > { %p1195_p0 = pnand %p1193_p12, %p1179_p13  ;;  %p1201_p2 = scmp.lt.s32.totalorder %s1199_s27, %s1192_s21 }
  0x24   : > { %p1196_p10 = pneg %p1195_p0  ;;  %p1202_p3 = por %p1201_p2, %p1200_p11 }
  0x26   : > { %p1203_p4 = pnand %p1202_p3, %p1196_p10 }
  0x28   : > { %1206 = shalt.err (!%p1203_p4)
}
  0x29   : > { %1118 = dma.hbm_to_vmem [thread:$0]  (!%p1414_p9), %s1410_s30, 1024, %s1418_s5, %s174_s7  }
  0x2a   : > { %p1701_p1 = scmp.lt.s32.totalorder %s1321_s17, 3  ;;  %p1702_p5 = scmp.ge.s32.totalorder %s1321_s17, 1 }
  0x2b   : > { %s824_s29 = sshll.u32 %s1403_s25, 10  ;;  %s838_s4 = sshll.u32 %s1317_s16, 14 }
  0x2c   : > { %p1452_p6 = pnand %p1702_p5, %p1701_p1  ;;  %s1461_s10 = scalar_lea.hbm %s1694_s1, %s838_s4 }
  0x2d   : > { %s198_s11 = scalar_lea.vmem [#allocation5], %s824_s29  ;;  %s195_s30 = scalar_lea.sflag [#allocation6], %s1403_s25 }
  0x2e   : > { %s206_s12 = sshll.u32 %s198_s11, 4  ;;  %s1207_s5 = scalar_lea.hbm %s1461_s10, 16384  ;;  %s1463_s12 = int_to_ptr.vmem [resolvable:$true] %s206_s12 }
  0x2f   : > { %p1208_p10 = scmp.ne.s32.totalorder %s1461_s10, %s1207_s5  ;;  %s1212_s21 = scalar_lea.hbm %s1694_s1, 32768 }
  0x30   : > { %p1213_p12 = scmp.lt.u32.totalorder %s1461_s10, %s1694_s1  ;;  %p1214_p0 = scmp.lt.u32.totalorder %s1212_s21, %s1207_s5 }
  0x31   : > { %p1210_p11 = pnand %p1208_p10, %p1179_p13  ;;  %p1216_p3 = scmp.lt.u32.totalorder %s1207_s5, %s1461_s10 }
  0x32   : > { %p1215_p2 = por %p1214_p0, %p1213_p12 }
  0x33   : > { %p1211_p8 = pneg %p1210_p11 }
  0x34   : > { %p1217_p4 = por %p1216_p3, %p1215_p2 }
  0x36   : > { %p1218_p1 = pnand %p1217_p4, %p1211_p8 }
  0x38   : > { %1221 = shalt.err (!%p1218_p1)
}
  0x39   : > { %s1222_s27 = scalar_lea.vmem %s1463_s12, 16384  ;;  %s1324_s29 = smov [#allocation5]  }
  0x3a   : > { %p1223_p5 = scmp.ne.s32.totalorder %s1463_s12, %s1222_s27  ;;  %s1227_s4 = sshll.u32 %s1324_s29, 4  ;;  %s1228_s4 = int_to_ptr.vmem [resolvable:$false] %s1227_s4 }
  0x3b   : > { %s1229_s8 = scalar_lea.vmem %s1228_s4, 32768  ;;  %p1230_p7 = scmp.lt.s32.totalorder %s1463_s12, %s1228_s4 }
  0x3c   : > { %p1225_p10 = pnand %p1223_p5, %p1179_p13  ;;  %p1231_p12 = scmp.lt.s32.totalorder %s1229_s8, %s1222_s27 }
  0x3e   : > { %p1226_p11 = pneg %p1225_p10  ;;  %p1232_p0 = por %p1231_p12, %p1230_p7 }
  0x40   : > { %p1233_p2 = pnand %p1232_p0, %p1226_p11 }
  0x42   : > { %1236 = shalt.err (!%p1233_p2)
}
  0x43   : > { %s1325_s9 = smov 128   ;;  %s1326_s11 = smov 8  }
  0x44   : > { %1121 = dma.hbm_to_vmem [thread:$0]  (!%p1414_p9), %s1461_s10, 16384, %s1463_s12, %s195_s30, %s1325_s9, %s1325_s9, %s1326_s11  }
  0x45   : > { %218 = sbr.rel (%p1452_p6) target bundleno = 414 (0x19e), region = 32  ;;  %s220_s5 = sand.u32 (!%p1452_p6), 1, %s1305_s13  }
  0x46   : > { %s828_s7 = sshll.u32 (!%p1452_p6), %s220_s5, 6  ;;  %s221_s20 = scalar_lea.sflag (!%p1452_p6), [#allocation3], %s220_s5 }
  0x47   : > { %s1494_s21 = scalar_lea.vmem (!%p1452_p6), [#allocation2], %s828_s7  ;;  %p1704_p7 = scmp.ne.s32.totalorder (!%p1452_p6), %s1699_s23, 0 }
  0x4c   : > { %1288 = dma.done.wait (%p1704_p7), %s221_s20, 1024  }
  0x4d   : > { %1290 = vsyncadd (%p1704_p7), %s221_s20, 4294966272  ;;  %s829_s22 = sshll.u32 %s220_s5, 10  ;;  %s230_s6 = scalar_lea.sflag [#allocation6], %s220_s5 }
  0x4e   : > { %s1500_s25 = scalar_lea.vmem [#allocation5], %s829_s22 }
  0x4f   : > { %1292 = dma.done.wait (%p1704_p7), %s230_s6, 16384  }
  0x50   : > { %1294 = vsyncadd (%p1704_p7), %s230_s6, 4294950912  ;;  %p830_p9 = scmp.ne.s32.totalorder %s1313_s15, 0 }
  0x51   : > { %v1327_v0 = vmov (!%p830_p9), 0.0  }
  0x52   : > { %267 = sbr.rel (%p830_p9) target bundleno = 89 (0x59), region = 44  ;;  %268 = vst [vmem:[#allocation7] sm:$0xff] (!%p830_p9), %v1327_v0 }
  0x59 PF: > { %v294_v1 = vld [vmem:[%s1500_s25 + $0x80] sm:$0xff]  ;;  %v295_v2 = vld [vmem:[%s1500_s25 + $0x88] sm:$0xff]  ;;  %v296_v12 = vld [vmem:[%s1500_s25 + $0x90] sm:$0xff]  ;;  %p831_p13 = scmp.ne.s32.totalorder %s1313_s15, 1 }
  0x5a   : > { %v326_v3 = vld [vmem:[%s1500_s25 + $0x180] sm:$0xff]  ;;  %v979_v4 = vpack.c.bf16 %v295_v2, %v294_v1  ;;  %v327_v5 = vld [vmem:[%s1500_s25 + $0x188] sm:$0xff]  ;;  %v297_v14 = vld [vmem:[%s1500_s25 + $0x98] sm:$0xff] }
  0x5b   : > { %v278_v6 = vld [vmem:[%s1500_s25] sm:$0xff]  ;;  %v279_v7 = vld [vmem:[%s1500_s25 + $0x8] sm:$0xff]  ;;  %v1011_v8 = vpack.c.bf16 %v327_v5, %v326_v3  ;;  %v328_v15 = vld [vmem:[%s1500_s25 + $0x190] sm:$0xff]  ;;  %v983_v17 = vpack.c.bf16 %v297_v14, %v296_v12 }
  0x5c   : > { %v981_v9 = vpack.c.bf16 %v279_v7, %v278_v6  ;;  %v310_v10 = vld [vmem:[%s1500_s25 + $0x100] sm:$0xff]  ;;  %v311_v11 = vld [vmem:[%s1500_s25 + $0x108] sm:$0xff]  ;;  %980 = vmatprep.subr.bf16.mxu0 %v979_v4  ;;  %v329_v16 = vld [vmem:[%s1500_s25 + $0x198] sm:$0xff] }
  0x5d   : > { %v1013_v13 = vpack.c.bf16 %v311_v11, %v310_v10  ;;  %1012 = vmatprep.subr.bf16.mxu1 %v1011_v8  ;;  %v1015_v18 = vpack.c.bf16 %v329_v16, %v328_v15  ;;  %v280_v19 = vld [vmem:[%s1500_s25 + $0x10] sm:$0xff]  ;;  %v281_v20 = vld [vmem:[%s1500_s25 + $0x18] sm:$0xff]  ;;  %v298_v24 = vld [vmem:[%s1500_s25 + $0xa0] sm:$0xff] }
  0x5e   : > { %982 = vmatpush3.bf16.msra.mxu0 %v981_v9  ;;  %v312_v21 = vld [vmem:[%s1500_s25 + $0x110] sm:$0xff]  ;;  %v985_v22 = vpack.c.bf16 %v281_v20, %v280_v19  ;;  %v313_v23 = vld [vmem:[%s1500_s25 + $0x118] sm:$0xff]  ;;  %v299_v25 = vld [vmem:[%s1500_s25 + $0xa8] sm:$0xff] }
  0x5f   : > { %1014 = vmatpush3.bf16.msra.mxu1 %v1013_v13  ;;  %984 = vmatprep.subr.bf16.mxu0 %v983_v17  ;;  %v1017_v26 = vpack.c.bf16 %v313_v23, %v312_v21  ;;  %v987_v27 = vpack.c.bf16 %v299_v25, %v298_v24  ;;  %v330_v28 = vld [vmem:[%s1500_s25 + $0x1a0] sm:$0xff]  ;;  %v331_v29 = vld [vmem:[%s1500_s25 + $0x1a8] sm:$0xff]  ;;  %v300_v36 = vld [vmem:[%s1500_s25 + $0xb0] sm:$0xff] }
  0x60   : > { %1016 = vmatprep.subr.bf16.mxu1 %v1015_v18  ;;  %v282_v30 = vld [vmem:[%s1500_s25 + $0x20] sm:$0xff]  ;;  %v1019_v31 = vpack.c.bf16 %v331_v29, %v330_v28  ;;  %v283_v32 = vld [vmem:[%s1500_s25 + $0x28] sm:$0xff]  ;;  %v301_v37 = vld [vmem:[%s1500_s25 + $0xb8] sm:$0xff] }
  0x61   : > { %v314_v33 = vld [vmem:[%s1500_s25 + $0x120] sm:$0xff]  ;;  %v315_v34 = vld [vmem:[%s1500_s25 + $0x128] sm:$0xff]  ;;  %v989_v35 = vpack.c.bf16 %v283_v32, %v282_v30  ;;  %v332_v38 = vld [vmem:[%s1500_s25 + $0x1b0] sm:$0xff]  ;;  %v991_v40 = vpack.c.bf16 %v301_v37, %v300_v36 }
  0x62   : > { %986 = vmatpush3.bf16.msra.mxu0 %v985_v22  ;;  %v1021_v39 = vpack.c.bf16 %v315_v34, %v314_v33  ;;  %v333_v41 = vld [vmem:[%s1500_s25 + $0x1b8] sm:$0xff]  ;;  %v284_v42 = vld [vmem:[%s1500_s25 + $0x30] sm:$0xff]  ;;  %v302_v47 = vld [vmem:[%s1500_s25 + $0xc0] sm:$0xff] }
  0x63   : > { %1018 = vmatpush3.bf16.msra.mxu1 %v1017_v26  ;;  %988 = vmatprep.subr.bf16.mxu0 %v987_v27  ;;  %v285_v43 = vld [vmem:[%s1500_s25 + $0x38] sm:$0xff]  ;;  %v1023_v44 = vpack.c.bf16 %v333_v41, %v332_v38  ;;  %v316_v45 = vld [vmem:[%s1500_s25 + $0x130] sm:$0xff]  ;;  %v303_v48 = vld [vmem:[%s1500_s25 + $0xc8] sm:$0xff] }
  0x64   : > { %1020 = vmatprep.subr.bf16.mxu1 %v1019_v31  ;;  %v317_v46 = vld [vmem:[%s1500_s25 + $0x138] sm:$0xff]  ;;  %v334_v49 = vld [vmem:[%s1500_s25 + $0x1c0] sm:$0xff]  ;;  %v335_v50 = vld [vmem:[%s1500_s25 + $0x1c8] sm:$0xff]  ;;  %v993_v51 = vpack.c.bf16 %v285_v43, %v284_v42  ;;  %v995_v53 = vpack.c.bf16 %v303_v48, %v302_v47 }
  0x65   : > { %v1025_v52 = vpack.c.bf16 %v317_v46, %v316_v45  ;;  %v286_v54 = vld [vmem:[%s1500_s25 + $0x40] sm:$0xff]  ;;  %v287_v55 = vld [vmem:[%s1500_s25 + $0x48] sm:$0xff]  ;;  %v1027_v57 = vpack.c.bf16 %v335_v50, %v334_v49  ;;  %v304_v59 = vld [vmem:[%s1500_s25 + $0xd0] sm:$0xff] }
  0x66   : > { %990 = vmatpush3.bf16.msra.mxu0 %v989_v35  ;;  %v318_v56 = vld [vmem:[%s1500_s25 + $0x140] sm:$0xff]  ;;  %v319_v58 = vld [vmem:[%s1500_s25 + $0x148] sm:$0xff]  ;;  %v305_v60 = vld [vmem:[%s1500_s25 + $0xd8] sm:$0xff]  ;;  %v997_v63 = vpack.c.bf16 %v287_v55, %v286_v54 }
  0x67   : > { %1022 = vmatpush3.bf16.msra.mxu1 %v1021_v39  ;;  %992 = vmatprep.subr.bf16.mxu0 %v991_v40  ;;  %v336_v61 = vld [vmem:[%s1500_s25 + $0x1d0] sm:$0xff]  ;;  %v337_v62 = vld [vmem:[%s1500_s25 + $0x1d8] sm:$0xff]  ;;  %v1029_v0 = vpack.c.bf16 %v319_v58, %v318_v56  ;;  %v999_v1 = vpack.c.bf16 %v305_v60, %v304_v59  ;;  %v306_v7 = vld [vmem:[%s1500_s25 + $0xe0] sm:$0xff] }
  0x68   : > { %1024 = vmatprep.subr.bf16.mxu1 %v1023_v44  ;;  %v288_v2 = vld [vmem:[%s1500_s25 + $0x50] sm:$0xff]  ;;  %v289_v3 = vld [vmem:[%s1500_s25 + $0x58] sm:$0xff]  ;;  %v1031_v5 = vpack.c.bf16 %v337_v62, %v336_v61  ;;  %v307_v8 = vld [vmem:[%s1500_s25 + $0xe8] sm:$0xff] }
  0x69   : > { %v320_v4 = vld [vmem:[%s1500_s25 + $0x150] sm:$0xff]  ;;  %v321_v6 = vld [vmem:[%s1500_s25 + $0x158] sm:$0xff]  ;;  %v338_v9 = vld [vmem:[%s1500_s25 + $0x1e0] sm:$0xff]  ;;  %v1001_v11 = vpack.c.bf16 %v289_v3, %v288_v2  ;;  %v1003_v15 = vpack.c.bf16 %v307_v8, %v306_v7 }
  0x6a   : > { %994 = vmatpush3.bf16.msra.mxu0 %v993_v51  ;;  %v339_v10 = vld [vmem:[%s1500_s25 + $0x1e8] sm:$0xff]  ;;  %v290_v12 = vld [vmem:[%s1500_s25 + $0x60] sm:$0xff]  ;;  %v1033_v14 = vpack.c.bf16 %v321_v6, %v320_v4  ;;  %v273_v18 = vld [vmem:[%s1494_s21 + $0x18] sm:$0xff] }
  0x6b   : > { %1026 = vmatpush3.bf16.msra.mxu1 %v1025_v52  ;;  %996 = vmatprep.subr.bf16.mxu0 %v995_v53  ;;  %v291_v13 = vld [vmem:[%s1500_s25 + $0x68] sm:$0xff]  ;;  %v322_v16 = vld [vmem:[%s1500_s25 + $0x160] sm:$0xff]  ;;  %v1035_v19 = vpack.c.bf16 %v339_v10, %v338_v9  ;;  %v308_v21 = vld [vmem:[%s1500_s25 + $0xf0] sm:$0xff] }
  0x6c   : > { %1028 = vmatprep.subr.bf16.mxu1 %v1027_v57  ;;  %v271_v17 = vld [vmem:[%s1494_s21 + $0x8] sm:$0xff]  ;;  %v309_v22 = vld [vmem:[%s1500_s25 + $0xf8] sm:$0xff]  ;;  %v340_v23 = vld [vmem:[%s1500_s25 + $0x1f0] sm:$0xff]  ;;  %540 = vmatprep.mubr.f32.mxu1 %v273_v18  ;;  %v1005_v25 = vpack.c.bf16 %v291_v13, %v290_v12 }
  0x6d   : > { %v323_v20 = vld [vmem:[%s1500_s25 + $0x168] sm:$0xff]  ;;  %470 = vmatprep.mubr.f32.mxu0 %v271_v17  ;;  %v341_v24 = vld [vmem:[%s1500_s25 + $0x1f8] sm:$0xff]  ;;  %v1007_v27 = vpack.c.bf16 %v309_v22, %v308_v21  ;;  %v292_v28 = vld [vmem:[%s1500_s25 + $0x70] sm:$0xff] }
  0x6e   : > { %998 = vmatpush3.bf16.msra.mxu0 %v997_v63  ;;  %v1037_v26 = vpack.c.bf16 %v323_v20, %v322_v16  ;;  %v293_v29 = vld [vmem:[%s1500_s25 + $0x78] sm:$0xff]  ;;  %v324_v30 = vld [vmem:[%s1500_s25 + $0x170] sm:$0xff]  ;;  %v1039_v31 = vpack.c.bf16 %v341_v24, %v340_v23  ;;  %v358_v33 = vld [vmem:[%s1500_s25 + $0x280] sm:$0xff] }
  0x6f   : > { %1030 = vmatpush3.bf16.msra.mxu1 %v1029_v0  ;;  %1000 = vmatprep.subr.bf16.mxu0 %v999_v1  ;;  %v325_v32 = vld [vmem:[%s1500_s25 + $0x178] sm:$0xff]  ;;  %v359_v34 = vld [vmem:[%s1500_s25 + $0x288] sm:$0xff]  ;;  %v390_v35 = vld [vmem:[%s1500_s25 + $0x380] sm:$0xff]  ;;  %v1009_v37 = vpack.c.bf16 %v293_v29, %v292_v28 }
  0x70   : > { %1032 = vmatprep.subr.bf16.mxu1 %v1031_v5  ;;  %v391_v36 = vld [vmem:[%s1500_s25 + $0x388] sm:$0xff]  ;;  %v1041_v38 = vpack.c.bf16 %v325_v32, %v324_v30  ;;  %v1043_v39 = vpack.c.bf16 %v359_v34, %v358_v33  ;;  %v342_v40 = vld [vmem:[%s1500_s25 + $0x200] sm:$0xff]  ;;  %v360_v45 = vld [vmem:[%s1500_s25 + $0x290] sm:$0xff] }
  0x71   : > { %v343_v41 = vld [vmem:[%s1500_s25 + $0x208] sm:$0xff]  ;;  %v374_v42 = vld [vmem:[%s1500_s25 + $0x300] sm:$0xff]  ;;  %v1075_v43 = vpack.c.bf16 %v391_v36, %v390_v35  ;;  %v361_v46 = vld [vmem:[%s1500_s25 + $0x298] sm:$0xff] }
  0x72   : > { %1002 = vmatpush3.bf16.msra.mxu0 %v1001_v11  ;;  %v375_v44 = vld [vmem:[%s1500_s25 + $0x308] sm:$0xff]  ;;  %v392_v47 = vld [vmem:[%s1500_s25 + $0x390] sm:$0xff]  ;;  %v393_v48 = vld [vmem:[%s1500_s25 + $0x398] sm:$0xff]  ;;  %v1045_v51 = vpack.c.bf16 %v343_v41, %v342_v40  ;;  %v1047_v53 = vpack.c.bf16 %v361_v46, %v360_v45 }
  0x73   : > { %1034 = vmatpush3.bf16.msra.mxu1 %v1033_v14  ;;  %1004 = vmatprep.subr.bf16.mxu0 %v1003_v15  ;;  %v270_v49 = vld [vmem:[%s1494_s21] sm:$0xff]  ;;  %v272_v50 = vld [vmem:[%s1494_s21 + $0x10] sm:$0xff]  ;;  %v1077_v52 = vpack.c.bf16 %v375_v44, %v374_v42  ;;  %v345_v55 = vld [vmem:[%s1500_s25 + $0x218] sm:$0xff]  ;;  %v1079_v57 = vpack.c.bf16 %v393_v48, %v392_v47 }
  0x74   : > { %1036 = vmatprep.subr.bf16.mxu1 %v1035_v19  ;;  %v344_v54 = vld [vmem:[%s1500_s25 + $0x210] sm:$0xff]  ;;  %v377_v58 = vld [vmem:[%s1500_s25 + $0x318] sm:$0xff]  ;;  %v362_v59 = vld [vmem:[%s1500_s25 + $0x2a0] sm:$0xff] }
  0x75   : > { %v376_v56 = vld [vmem:[%s1500_s25 + $0x310] sm:$0xff]  ;;  %v363_v60 = vld [vmem:[%s1500_s25 + $0x2a8] sm:$0xff]  ;;  %v394_v61 = vld [vmem:[%s1500_s25 + $0x3a0] sm:$0xff]  ;;  %v1049_v63 = vpack.c.bf16 %v345_v55, %v344_v54 }
  0x76   : > { %1006 = vmatpush3.bf16.msra.mxu0 %v1005_v25  ;;  %v395_v62 = vld [vmem:[%s1500_s25 + $0x3a8] sm:$0xff]  ;;  %v1081_v0 = vpack.c.bf16 %v377_v58, %v376_v56  ;;  %v1051_v1 = vpack.c.bf16 %v363_v60, %v362_v59  ;;  %v346_v2 = vld [vmem:[%s1500_s25 + $0x220] sm:$0xff]  ;;  %v364_v7 = vld [vmem:[%s1500_s25 + $0x2b0] sm:$0xff] }
  0x77   : > { %1038 = vmatpush3.bf16.msra.mxu1 %v1037_v26  ;;  %1008 = vmatprep.subr.bf16.mxu0 %v1007_v27  ;;  %v347_v3 = vld [vmem:[%s1500_s25 + $0x228] sm:$0xff]  ;;  %v378_v4 = vld [vmem:[%s1500_s25 + $0x320] sm:$0xff]  ;;  %v1083_v5 = vpack.c.bf16 %v395_v62, %v394_v61  ;;  %v365_v8 = vld [vmem:[%s1500_s25 + $0x2b8] sm:$0xff] }
  0x78   : > { %1040 = vmatprep.subr.bf16.mxu1 %v1039_v31  ;;  %v379_v6 = vld [vmem:[%s1500_s25 + $0x328] sm:$0xff]  ;;  %v396_v9 = vld [vmem:[%s1500_s25 + $0x3b0] sm:$0xff]  ;;  %v397_v10 = vld [vmem:[%s1500_s25 + $0x3b8] sm:$0xff]  ;;  %v1053_v11 = vpack.c.bf16 %v347_v3, %v346_v2  ;;  %v1055_v13 = vpack.c.bf16 %v365_v8, %v364_v7 }
  0x79   : > { %v1085_v12 = vpack.c.bf16 %v379_v6, %v378_v4  ;;  %v348_v14 = vld [vmem:[%s1500_s25 + $0x230] sm:$0xff]  ;;  %v349_v15 = vld [vmem:[%s1500_s25 + $0x238] sm:$0xff]  ;;  %v1087_v17 = vpack.c.bf16 %v397_v10, %v396_v9  ;;  %v366_v19 = vld [vmem:[%s1500_s25 + $0x2c0] sm:$0xff] }
  0x7a   : > { %1010 = vmatpush3.bf16.msra.mxu0 %v1009_v37  ;;  %v380_v16 = vld [vmem:[%s1500_s25 + $0x330] sm:$0xff]  ;;  %v381_v18 = vld [vmem:[%s1500_s25 + $0x338] sm:$0xff]  ;;  %v367_v20 = vld [vmem:[%s1500_s25 + $0x2c8] sm:$0xff]  ;;  %v1057_v23 = vpack.c.bf16 %v349_v15, %v348_v14 }
  0x7b   : > { %1042 = vmatpush3.bf16.msra.mxu1 %v1041_v38  ;;  %1044 = vmatprep.subr.bf16.mxu0 %v1043_v39  ;;  %v398_v21 = vld [vmem:[%s1500_s25 + $0x3c0] sm:$0xff]  ;;  %v399_v22 = vld [vmem:[%s1500_s25 + $0x3c8] sm:$0xff]  ;;  %v277_v25 = vld [vmem:[%s1494_s21 + $0x38] sm:$0xff]  ;;  %v1089_v26 = vpack.c.bf16 %v381_v18, %v380_v16  ;;  %v1059_v27 = vpack.c.bf16 %v367_v20, %v366_v19 }
  0x7c   : > { %1076 = vmatprep.subr.bf16.mxu1 %v1075_v43  ;;  %v275_v24 = vld [vmem:[%s1494_s21 + $0x28] sm:$0xff]  ;;  %v350_v28 = vld [vmem:[%s1500_s25 + $0x240] sm:$0xff]  ;;  %v1091_v31 = vpack.c.bf16 %v399_v22, %v398_v21  ;;  %v368_v33 = vld [vmem:[%s1500_s25 + $0x2d0] sm:$0xff] }
  0x7d   : > { %471 = vmatmul.mubr.f32.vlgmr.msra.gmra.mrb[0].mxu0 %v270_v49  ;;  %v351_v29 = vld [vmem:[%s1500_s25 + $0x248] sm:$0xff]  ;;  %v382_v30 = vld [vmem:[%s1500_s25 + $0x340] sm:$0xff]  ;;  %v369_v34 = vld [vmem:[%s1500_s25 + $0x2d8] sm:$0xff] }
  0x7e   : > { %541 = vmatmul.mubr.f32.vlgmr.msra.gmra.mrb[0].mxu1 %v272_v50  ;;  %1046 = vmatpush3.bf16.msra.mxu0 %v1045_v51  ;;  %v383_v32 = vld [vmem:[%s1500_s25 + $0x348] sm:$0xff]  ;;  %v400_v35 = vld [vmem:[%s1500_s25 + $0x3d0] sm:$0xff]  ;;  %v401_v36 = vld [vmem:[%s1500_s25 + $0x3d8] sm:$0xff]  ;;  %v1061_v37 = vpack.c.bf16 %v351_v29, %v350_v28  ;;  %v1063_v39 = vpack.c.bf16 %v369_v34, %v368_v33 }
  0x7f   : > { %1078 = vmatpush3.bf16.msra.mxu1 %v1077_v52  ;;  %1048 = vmatprep.subr.bf16.mxu0 %v1047_v53  ;;  %v1093_v38 = vpack.c.bf16 %v383_v32, %v382_v30  ;;  %v352_v40 = vld [vmem:[%s1500_s25 + $0x250] sm:$0xff]  ;;  %v353_v41 = vld [vmem:[%s1500_s25 + $0x258] sm:$0xff]  ;;  %v1095_v43 = vpack.c.bf16 %v401_v36, %v400_v35  ;;  %v370_v45 = vld [vmem:[%s1500_s25 + $0x2e0] sm:$0xff] }
  0x80   : > { %1080 = vmatprep.subr.bf16.mxu1 %v1079_v57  ;;  %610 = vmatprep.mubr.f32.mxu0 %v275_v24  ;;  %v384_v42 = vld [vmem:[%s1500_s25 + $0x350] sm:$0xff]  ;;  %v385_v44 = vld [vmem:[%s1500_s25 + $0x358] sm:$0xff]  ;;  %v371_v46 = vld [vmem:[%s1500_s25 + $0x2e8] sm:$0xff]  ;;  %v1065_v49 = vpack.c.bf16 %v353_v41, %v352_v40 }
  0x81   : > { %680 = vmatprep.mubr.f32.mxu1 %v277_v25  ;;  %v402_v47 = vld [vmem:[%s1500_s25 + $0x3e0] sm:$0xff]  ;;  %v403_v48 = vld [vmem:[%s1500_s25 + $0x3e8] sm:$0xff]  ;;  %v1097_v50 = vpack.c.bf16 %v385_v44, %v384_v42  ;;  %v1067_v51 = vpack.c.bf16 %v371_v46, %v370_v45  ;;  %v372_v57 = vld [vmem:[%s1500_s25 + $0x2f0] sm:$0xff] }
  0x82   : > { %1050 = vmatpush3.bf16.msra.mxu0 %v1049_v63  ;;  %v354_v52 = vld [vmem:[%s1500_s25 + $0x260] sm:$0xff]  ;;  %v355_v53 = vld [vmem:[%s1500_s25 + $0x268] sm:$0xff]  ;;  %v1099_v55 = vpack.c.bf16 %v403_v48, %v402_v47  ;;  %v373_v58 = vld [vmem:[%s1500_s25 + $0x2f8] sm:$0xff] }
  0x83   : > { %1082 = vmatpush3.bf16.msra.mxu1 %v1081_v0  ;;  %1052 = vmatprep.subr.bf16.mxu0 %v1051_v1  ;;  %v386_v54 = vld [vmem:[%s1500_s25 + $0x360] sm:$0xff]  ;;  %v387_v56 = vld [vmem:[%s1500_s25 + $0x368] sm:$0xff]  ;;  %v404_v59 = vld [vmem:[%s1500_s25 + $0x3f0] sm:$0xff]  ;;  %v1069_v61 = vpack.c.bf16 %v355_v53, %v354_v52  ;;  %v1071_v63 = vpack.c.bf16 %v373_v58, %v372_v57 }
  0x84   : > { %1084 = vmatprep.subr.bf16.mxu1 %v1083_v5  ;;  %v405_v60 = vld [vmem:[%s1500_s25 + $0x3f8] sm:$0xff]  ;;  %v1101_v62 = vpack.c.bf16 %v387_v56, %v386_v54  ;;  %v356_v0 = vld [vmem:[%s1500_s25 + $0x270] sm:$0xff]  ;;  %v274_v7 = vld [vmem:[%s1494_s21 + $0x20] sm:$0xff] }
  0x85   : > { %v357_v1 = vld [vmem:[%s1500_s25 + $0x278] sm:$0xff]  ;;  %v1103_v2 = vpack.c.bf16 %v405_v60, %v404_v59  ;;  %v388_v3 = vld [vmem:[%s1500_s25 + $0x370] sm:$0xff] }
  0x86   : > { %1054 = vmatpush3.bf16.msra.mxu0 %v1053_v11  ;;  %v389_v4 = vld [vmem:[%s1500_s25 + $0x378] sm:$0xff]  ;;  %v1073_v5 = vpack.c.bf16 %v357_v1, %v356_v0  ;;  %v276_v8 = vld [vmem:[%s1494_s21 + $0x30] sm:$0xff] }
  0x87   : > { %1086 = vmatpush3.bf16.msra.mxu1 %v1085_v12  ;;  %1056 = vmatprep.subr.bf16.mxu0 %v1055_v13  ;;  %v1105_v6 = vpack.c.bf16 %v389_v4, %v388_v3 }
  0x88   : > { %1088 = vmatprep.subr.bf16.mxu1 %v1087_v17 }
  0x8a   : > { %1058 = vmatpush3.bf16.msra.mxu0 %v1057_v23  ;;  %v269_v23 = vld [vmem:[#allocation7] sm:$0xff] }
  0x8b   : > { %1090 = vmatpush3.bf16.msra.mxu1 %v1089_v26  ;;  %1060 = vmatprep.subr.bf16.mxu0 %v1059_v27  ;;  %v832_v27 = vld [vmem:[%s1695_s2] ss:$0 sm:$0xff] (!%p831_p13) }
  0x8c   : > { %1092 = vmatprep.subr.bf16.mxu1 %v1091_v31 }
  0x8e   : > { %1062 = vmatpush3.bf16.msra.mxu0 %v1061_v37 }
  0x8f   : > { %1094 = vmatpush3.bf16.msra.mxu1 %v1093_v38  ;;  %1064 = vmatprep.subr.bf16.mxu0 %v1063_v39 }
  0x90   : > { %1096 = vmatprep.subr.bf16.mxu1 %v1095_v43 }
  0x92   : > { %1066 = vmatpush3.bf16.msra.mxu0 %v1065_v49 }
  0x93   : > { %1098 = vmatpush3.bf16.msra.mxu1 %v1097_v50  ;;  %1068 = vmatprep.subr.bf16.mxu0 %v1067_v51 }
  0x94   : > { %1100 = vmatprep.subr.bf16.mxu1 %v1099_v55 }
  0x96   : > { %1070 = vmatpush3.bf16.msra.mxu0 %v1069_v61 }
  0x97   : > { %1102 = vmatpush3.bf16.msra.mxu1 %v1101_v62  ;;  %1072 = vmatprep.subr.bf16.mxu0 %v1071_v63 }
  0x98   : > { %1104 = vmatprep.subr.bf16.mxu1 %v1103_v2 }
  0x9a   : > { %1074 = vmatpush3.bf16.msra.mxu0 %v1073_v5 }
  0x9b   : > { %1106 = vmatpush3.bf16.msra.mxu1 %v1105_v6 }
  0x9d   : > { %611 = vmatmul.mubr.f32.vlgmr.msra.gmra.mrb[2].mxu0 %v274_v7 }
  0x9e   : > { %681 = vmatmul.mubr.f32.vlgmr.msra.gmra.mrb[2].mxu1 %v276_v8 }
 0x150   : > { %v871_v9 = vpop.f32.mrb[0].mxu0 }
 0x151   : > { %v906_v10 = vpop.f32.mrb[0].mxu1  ;;  %v872_v11 = vpop.f32.mrb[1].mxu0 }
 0x152   : > { %v873_v12 = vadd.f32 %v872_v11, %v871_v9  ;;  %v907_v13 = vpop.f32.mrb[1].mxu1 }
 0x153   : > { %v908_v14 = vadd.f32 %v907_v13, %v906_v10 }
 0x155   : > { %v543_v15 = vadd.f32 %v908_v14, %v873_v12 }
 0x170   : > { %v941_v16 = vpop.f32.mrb[2].mxu0 }
 0x171   : > { %v942_v17 = vpop.f32.mrb[3].mxu0  ;;  %v976_v18 = vpop.f32.mrb[2].mxu1 }
 0x172   : > { %v943_v19 = vadd.f32 %v942_v17, %v941_v16  ;;  %v977_v20 = vpop.f32.mrb[3].mxu1 }
 0x173   : > { %v978_v21 = vadd.f32 %v977_v20, %v976_v18 }
 0x174   : > { %v613_v22 = vadd.f32 %v943_v19, %v543_v15  ;;  %691 = sbr.rel (%p831_p13) target bundleno = 389 (0x185), region = 48 }
 0x176   : > { %v683_v24 = vadd.f32 %v978_v21, %v613_v22 }
 0x178   : > { %v686_v25 = vadd.f32 %v683_v24, %v269_v23 }
 0x17a   : > { %687 = vst [vmem:[#allocation7] sm:$0xff] %v686_v25 }
 0x181   : > { %v692_v26 = vld [vmem:[#allocation7] sm:$0xff] }
 0x182   : > { %v700_v28 = vadd.f32 %v832_v27, %v692_v26 }
 0x184   : > { %701 = vst [vmem:[#allocation7] sm:$0xff] %v700_v28 }
 0x185 PF: > { %p1649_p6 = scmp.eq.s32.totalorder %s817_s18, 1  ;;  %s1328_s12 = smov [#allocation7]  }
 0x186   : > { %s712_s30 = sshll.u32 %s1328_s12, 4  ;;  %s713_s30 = int_to_ptr.vmem [resolvable:$true] %s712_s30 }
 0x187   : > { %s1237_s15 = scalar_lea.vmem %s713_s30, 128  ;;  %p1244_p1 = scmp.lt.s32.totalorder %s713_s30, %s713_s30 }
 0x188   : > { %p1238_p8 = scmp.ne.s32.totalorder %s713_s30, %s1237_s15  ;;  %p1245_p5 = scmp.lt.s32.totalorder %s1237_s15, %s1237_s15 }
 0x18a   : > { %p1239_p3 = pnand %p1238_p8, %p1649_p6  ;;  %p1246_p10 = por %p1245_p5, %p1244_p1 }
 0x18c   : > { %p1240_p4 = pneg %p1239_p3 }
 0x18e   : > { %p1247_p11 = pnand %p1246_p10, %p1240_p4 }
 0x190   : > { %1250 = shalt.err (!%p1247_p11)
}
 0x191   : > { %s1251_s18 = scalar_lea.hbm %s1696_s3, 128 }
 0x192   : > { %p1252_p12 = scmp.ne.s32.totalorder %s1696_s3, %s1251_s18  ;;  %p1257_p7 = scmp.lt.u32.totalorder %s1251_s18, %s1696_s3 }
 0x194   : > { %p1253_p0 = pnand %p1252_p12, %p1649_p6 }
 0x196   : > { %p1254_p2 = pneg %p1253_p0 }
 0x198   : > { %p1259_p9 = pnand %p1257_p7, %p1254_p2 }
 0x19a   : > { %1262 = shalt.err (!%p1259_p9)
}
 0x19b   : > { %1112 = dma.vmem_to_hbm [thread:$0]  (%p1649_p6), %s713_s30, 128, %s1696_s3, [#allocation4]  }
 0x19c   : > { %1296 = dma.done.wait (%p1649_p6), [#allocation4], 128  }
 0x19d   : > { %1298 = vsyncadd (%p1649_p6), [#allocation4], 4294967168 }
 0x19e PF: > { %s20_s17 = sadd.s32 1, %s1321_s17   ;;  %s1706_s12 = smov %s1305_s13 }
 0x19f   : > { %p17_p13 = scmp.ge.s32.totalorder %s20_s17, 4   ;;  %s1707_s13 = smov %s1309_s14 }
 0x1a0   : > { %s1708_s14 = smov %s1400_s24  ;;  %s1709_s15 = smov %s1317_s16 }
 0x1a1   : > { %s1710_s16 = smov %s1712_s19  ;;  %19 = sbr.rel (!%p17_p13) target bundleno = 7 (0x7), region = 94 }
 0x1a8   :  { %725 = vsyncpa [#allocation3], 1 }
 0x1a9   :  { %727 = vsyncpa [#allocation3 + $0x1], 1 }
 0x1aa   :  { %728 = vsyncpa [#allocation6], 1 }
 0x1ab   :  { %730 = vsyncpa [#allocation6 + $0x1], 1 }
 0x1ac   :  { %731 = vsyncpa [#allocation4], 1 }
 0x1ad   :  { %733 = vsyncpa [#allocation4 + $0x1], 1 }

</bundles_post_ra>
